<compile_context>
chip_gen: v5e
topology: v5e:2x2
jax: 0.10.0
libtpu: 0.0.40
codegen_flags: <defaults>
</compile_context>

<pallas_src>
import functools

import jax
import jax.numpy as jnp
from jax.experimental import pallas as pl
from jax.experimental.pallas import tpu as pltpu


def _round_up(x, m):
    return ((x + m - 1) // m) * m


def _vmem_limit_bytes():
    """Per-generation scoped-VMEM limit (leave headroom under physical VMEM)."""
    try:
        cap = int(pltpu.get_tpu_info().vmem_capacity_bytes)
    except Exception:
        cap = 64 * 2**20          # conservative: v7x per-TensorCore VMEM
    return int(min(cap * 3 // 4, 96 * 2**20))


# ---------------------------------------------------------------------------
# Kernels
# ---------------------------------------------------------------------------

def _head_kernel_cls(x_ref, w1_ref, b1_ref, w2_ref, b2_ref, out_ref):
    """x_ref: [TB, H] CLS-token features (S dim squeezed by the BlockSpec)."""
    x = x_ref[...].astype(w1_ref.dtype)
    h = jnp.dot(x, w1_ref[...], preferred_element_type=jnp.float32)
    h = jnp.tanh(h + b1_ref[...])                      # bias broadcasts [1,H]
    y = jnp.dot(h.astype(w2_ref.dtype), w2_ref[...],
                preferred_element_type=jnp.float32)
    out_ref[...] = (y + b2_ref[...]).astype(out_ref.dtype)


def _head_kernel_sum(feat_ref, w1_ref, b1_ref, w2_ref, b2_ref, out_ref,
                     acc_ref, *, seq_len, ts):
    """feat_ref: [TB, TS, H]; grid axis 1 streams S chunks (reduction axis)."""
    sk = pl.program_id(1)

    @pl.when(sk == 0)
    def _():
        acc_ref[...] = jnp.zeros_like(acc_ref)

    feat = feat_ref[...].astype(jnp.float32)            # native dtype streamed
    if seq_len % ts != 0:
        # Ragged last S chunk: rows past seq_len hold undefined data (read
        # past the array bound); zero them so they never enter the sum.
        row = jax.lax.broadcasted_iota(jnp.int32, feat.shape, 1) + sk * ts
        feat = jnp.where(row < seq_len, feat, 0.0)
    acc_ref[...] += jnp.sum(feat, axis=1)

    @pl.when(sk == pl.num_programs(1) - 1)
    def _():
        # Keep the summed LHS in f32 (long-sequence sums lose precision in
        # bf16); weights may still be bf16 and are promoted on the fly.
        x = acc_ref[...]
        h = jnp.dot(x, w1_ref[...].astype(jnp.float32),
                    preferred_element_type=jnp.float32)
        h = jnp.tanh(h + b1_ref[...])
        y = jnp.dot(h.astype(w2_ref.dtype), w2_ref[...],
                    preferred_element_type=jnp.float32)
        out_ref[...] = (y + b2_ref[...]).astype(out_ref.dtype)


# ---------------------------------------------------------------------------
# Wrapper
# ---------------------------------------------------------------------------

def roberta_classification_head(features, w_dense, b_dense, w_out, b_out,
                                extract_embeddings: bool = False,
                                use_bf16: bool = False,
                                tb: int = None, ts: int = None):
    """features: [B, S, H]; w_dense: [H, H]; b_dense: [H];
       w_out: [H, L]; b_out: [L]  ->  [B, L] f32.
       Weights are stored [in_features, out_features] (transposed vs torch)."""
    B, S, H = features.shape
    L = w_out.shape[1]
    compute_dtype = jnp.bfloat16 if use_bf16 else jnp.float32
    feat_bytes = features.dtype.itemsize
    vmem_limit = _vmem_limit_bytes()

    # Lane-dense output: pad the label dim to exactly 128 lanes (zero columns
    # + zero bias keep values exact); sliced back to [:, :L] at the end.
    Lp = _round_up(L, 128)
    if Lp != L:
        w_out_p = jnp.zeros((H, Lp), w_out.dtype).at[:, :L].set(w_out)
        b_out_p = jnp.zeros((Lp,), b_out.dtype).at[:L].set(b_out)
    else:
        w_out_p, b_out_p = w_out, b_out

    # Only the (small) weights are cast; the big streamed tensor keeps its
    # native dtype.  Biases stay f32 and add into the f32 accumulator.
    w1 = w_dense.astype(compute_dtype)
    w2 = w_out_p.astype(compute_dtype)
    b1 = b_dense.astype(jnp.float32).reshape(1, H)
    b2 = b_out_p.astype(jnp.float32).reshape(1, Lp)
    w_bytes = w1.dtype.itemsize

    if not extract_embeddings:
        # ------------------------------------------------------------------
        # CLS path: read only features[:, 0, :] straight from HBM.
        # ------------------------------------------------------------------
        if tb is not None:
            TB = tb
        elif B <= 512:
            TB = B                      # full batch in one tile (B = full dim)
        else:
            TB = 512                    # fills the 256-wide MXU M dim (v6e/v7x)
        nb = pl.cdiv(B, TB)

        cost = pl.CostEstimate(
            flops=2 * B * H * H + 2 * B * H * Lp,
            transcendentals=B * H,
            bytes_accessed=(B * H * feat_bytes
                            + (H * H + H * Lp) * w_bytes
                            + (H + Lp) * 4 + B * Lp * 4))

        def call_cls(strided_cls, buffered):
            pm_w = {"pipeline_mode": pl.Buffered(1)} if buffered else {}
            weight_specs = [
                pl.BlockSpec((H, H), lambda bi: (0, 0), **pm_w),
                pl.BlockSpec((1, H), lambda bi: (0, 0), **pm_w),
                pl.BlockSpec((H, Lp), lambda bi: (0, 0), **pm_w),
                pl.BlockSpec((1, Lp), lambda bi: (0, 0), **pm_w),
            ]
            if strided_cls:
                # (TB, 1, H) strided DMA of exactly the CLS rows; no wrapper
                # slice / pad copy and no extra HBM intermediate.
                x_in = features
                x_spec = pl.BlockSpec((TB, None, H), lambda bi: (bi, 0, 0))
            else:
                x_in = features[:, 0, :]
                x_spec = pl.BlockSpec((TB, H), lambda bi: (bi, 0))
            return pl.pallas_call(
                _head_kernel_cls,
                out_shape=jax.ShapeDtypeStruct((B, Lp), jnp.float32),
                grid=(nb,),
                in_specs=[x_spec] + weight_specs,
                out_specs=pl.BlockSpec((TB, Lp), lambda bi: (bi, 0)),
                compiler_params=pltpu.CompilerParams(
                    dimension_semantics=("parallel",),
                    vmem_limit_bytes=vmem_limit),
                cost_estimate=cost,
            )(x_in, w1, b1, w2, b2)

        try:
            out = call_cls(True, True)
        except Exception:               # fallback if this jax build rejects
            out = call_cls(False, False)   # pipeline_mode / squeezed S block

    else:
        # ------------------------------------------------------------------
        # Sum path: stream S chunks, accumulate in f32 VMEM scratch.
        # ------------------------------------------------------------------
        if tb is not None:
            TB = tb
        elif B <= 128:
            TB = B
            # v7x has 2 TensorCores: when per-tile work is non-trivial, split
            # the "parallel" batch axis so both cores get a tile.
            if B >= 16 and S * H * feat_bytes >= (2 << 20):
                cand = _round_up(pl.cdiv(B, 2), 8)
                if cand < B:
                    TB = cand
        else:
            TB = 128
        nb = pl.cdiv(B, TB)

        # Right-size the streamed S chunk from the VMEM budget: each feature
        # buffer is TB*TS*H*itemsize; triple-buffered, weights single-buffered.
        if ts is not None:
            TS = ts
        else:
            fixed = ((H * H + H * Lp) * w_bytes        # weights (1 buffer)
                     + (H + Lp) * 4                    # biases
                     + TB * H * 4                      # f32 accumulator
                     + 2 * TB * Lp * 4                 # out (2 buffers)
                     + (2 << 20))                      # slack
            budget = max(vmem_limit - fixed, 3 * TB * 8 * H * feat_bytes)
            per_buf = min(budget // 3, 8 << 20)        # <= ~8 MiB per buffer
            TS = max(8, per_buf // (TB * H * feat_bytes))
            TS = S if TS >= S else (TS // 8) * 8
        ns = pl.cdiv(S, TS)

        cost = pl.CostEstimate(
            flops=B * S * H + 2 * B * H * H + 2 * B * H * Lp,
            transcendentals=B * H,
            bytes_accessed=(B * S * H * feat_bytes
                            + (H * H + H * Lp) * w_bytes
                            + (H + Lp) * 4 + B * Lp * 4))

        kernel = functools.partial(_head_kernel_sum, seq_len=S, ts=TS)

        def call_sum(buffered):
            pm_w = {"pipeline_mode": pl.Buffered(1)} if buffered else {}
            pm_f = ({"pipeline_mode": pl.Buffered(min(3, ns))}
                    if (buffered and ns >= 2) else {})
            in_specs = [
                pl.BlockSpec((TB, TS, H), lambda bi, si: (bi, si, 0), **pm_f),
                pl.BlockSpec((H, H), lambda bi, si: (0, 0), **pm_w),
                pl.BlockSpec((1, H), lambda bi, si: (0, 0), **pm_w),
                pl.BlockSpec((H, Lp), lambda bi, si: (0, 0), **pm_w),
                pl.BlockSpec((1, Lp), lambda bi, si: (0, 0), **pm_w),
            ]
            return pl.pallas_call(
                kernel,
                out_shape=jax.ShapeDtypeStruct((B, Lp), jnp.float32),
                grid=(nb, ns),
                in_specs=in_specs,
                out_specs=pl.BlockSpec((TB, Lp), lambda bi, si: (bi, 0)),
                scratch_shapes=[pltpu.VMEM((TB, H), jnp.float32)],
                compiler_params=pltpu.CompilerParams(
                    dimension_semantics=("parallel", "arbitrary"),
                    vmem_limit_bytes=vmem_limit),
                cost_estimate=cost,
            )(features, w1, b1, w2, b2)

        try:
            out = call_sum(True)
        except Exception:               # fallback without pipeline_mode
            out = call_sum(False)

    return out[:, :L]


def _reference(features, w_dense, b_dense, w_out, b_out, extract_embeddings):
    f = features.astype(jnp.float32)
    x = jnp.sum(f, axis=1) if extract_embeddings else f[:, 0, :]
    h = jnp.tanh(x @ w_dense + b_dense)
    return h @ w_out + b_out


if __name__ == "__main__":
    # Small shapes implied by the module: hidden_size=32, num_labels=3,
    # batch=2, sequence length=8.
    B, S, H, L = 2, 8, 32, 3

    key = jax.random.PRNGKey(0)
    k_feat, k_w1, k_b1, k_w2, k_b2, k_feat2 = jax.random.split(key, 6)

    features = jax.random.normal(k_feat, (B, S, H), dtype=jnp.float32)
    w_dense = jax.random.normal(k_w1, (H, H), dtype=jnp.float32) * 0.05
    b_dense = jax.random.normal(k_b1, (H,), dtype=jnp.float32) * 0.05
    w_out = jax.random.normal(k_w2, (H, L), dtype=jnp.float32) * 0.05
    b_out = jax.random.normal(k_b2, (L,), dtype=jnp.float32) * 0.05

    ok = True
    for extract in (False, True):
        ref = _reference(features, w_dense, b_dense, w_out, b_out, extract)

        # f32 path: tight tolerance.
        out = jax.block_until_ready(roberta_classification_head(
            features, w_dense, b_dense, w_out, b_out,
            extract_embeddings=extract, use_bf16=False))
        ok &= (out.shape == (B, L))
        ok &= bool(jnp.allclose(out, ref, atol=1e-5, rtol=1e-5))

        # bf16 weights on the MXU: looser tolerance (f32 accumulate).
        out_bf = jax.block_until_ready(roberta_classification_head(
            features, w_dense, b_dense, w_out, b_out,
            extract_embeddings=extract, use_bf16=True))
        ok &= (out_bf.shape == (B, L))
        ok &= bool(jnp.allclose(out_bf, ref, atol=2e-2, rtol=5e-2))

    # Ragged tiles (TB does not divide B, TS does not divide S): exercises the
    # in-kernel masked partial sum and partial output stores (no jnp.pad).
    B2, S2 = 10, 12
    feats2 = jax.random.normal(k_feat2, (B2, S2, H), dtype=jnp.float32)
    for extract in (False, True):
        ref2 = _reference(feats2, w_dense, b_dense, w_out, b_out, extract)
        out2 = jax.block_until_ready(roberta_classification_head(
            feats2, w_dense, b_dense, w_out, b_out,
            extract_embeddings=extract, use_bf16=False, tb=8, ts=8))
        ok &= (out2.shape == (B2, L))
        ok &= bool(jnp.allclose(out2, ref2, atol=1e-5, rtol=1e-5))

    # Native bf16 activation streaming (halves feature HBM bytes on the
    # bandwidth-bound sum path); compare against a bf16-features reference.
    feats_bf = features.astype(jnp.bfloat16)
    ref_bf = _reference(feats_bf, w_dense, b_dense, w_out, b_out, True)
    out_nbf = jax.block_until_ready(roberta_classification_head(
        feats_bf, w_dense, b_dense, w_out, b_out,
        extract_embeddings=True, use_bf16=True))
    ok &= bool(jnp.allclose(out_nbf, ref_bf, atol=2e-2, rtol=5e-2))

    print("KERNEL_OK" if ok else "KERNEL_MISMATCH")
</pallas_src>

<mosaic_0001>
module attributes {stable_mosaic.version = 11 : i64} {
  func.func @_head_kernel_cls(%arg0: i32, %arg1: memref<2x32xf32, #tpu.memory_space<vmem>>, %arg2: memref<32x32xf32, #tpu.memory_space<vmem>>, %arg3: memref<1x32xf32, #tpu.memory_space<vmem>>, %arg4: memref<32x128xf32, #tpu.memory_space<vmem>>, %arg5: memref<1x128xf32, #tpu.memory_space<vmem>>, %arg6: memref<2x128xf32, #tpu.memory_space<vmem>>) attributes {dimension_semantics = [#tpu.dimension_semantics<parallel>], iteration_bounds = array<i64: 1>, scalar_prefetch = 0 : i64, scratch_operands = 0 : i64, tpu.core_type = #tpu.core_type<tc>, window_params = [{transform_indices = @transform_0, window_bounds = array<i64: 2, 32>}, {pipeline_mode = #tpu.pipeline_mode<synchronous>, transform_indices = @transform_1, window_bounds = array<i64: 32, 32>}, {pipeline_mode = #tpu.pipeline_mode<synchronous>, transform_indices = @transform_2, window_bounds = array<i64: 1, 32>}, {pipeline_mode = #tpu.pipeline_mode<synchronous>, transform_indices = @transform_3, window_bounds = array<i64: 32, 128>}, {pipeline_mode = #tpu.pipeline_mode<synchronous>, transform_indices = @transform_4, window_bounds = array<i64: 1, 128>}, {transform_indices = @transform_5, window_bounds = array<i64: 2, 128>}]} {
    %c0 = arith.constant 0 : index
    %c0_0 = arith.constant 0 : index
    %0 = vector.load %arg1[%c0, %c0_0] : memref<2x32xf32, #tpu.memory_space<vmem>>, vector<2x32xf32>
    %c0_1 = arith.constant 0 : index
    %c0_2 = arith.constant 0 : index
    %1 = vector.load %arg2[%c0_1, %c0_2] : memref<32x32xf32, #tpu.memory_space<vmem>>, vector<32x32xf32>
    %cst = arith.constant dense<0.000000e+00> : vector<2x32xf32>
    %2 = tpu.matmul %0, %1, %cst {dimension_numbers = #tpu.dot_dimension_numbers<[1], [0], [0], [1], [0, 0, 1, 1], [], []>} : vector<2x32xf32>, vector<32x32xf32>, vector<2x32xf32> -> vector<2x32xf32>
    %c0_3 = arith.constant 0 : index
    %c0_4 = arith.constant 0 : index
    %3 = vector.load %arg3[%c0_3, %c0_4] : memref<1x32xf32, #tpu.memory_space<vmem>>, vector<1x32xf32>
    %4 = vector.broadcast %3 : vector<1x32xf32> to vector<2x32xf32>
    %5 = arith.addf %2, %4 : vector<2x32xf32>
    %6 = math.tanh %5 : vector<2x32xf32>
    %c0_5 = arith.constant 0 : index
    %c0_6 = arith.constant 0 : index
    %7 = vector.load %arg4[%c0_5, %c0_6] : memref<32x128xf32, #tpu.memory_space<vmem>>, vector<32x128xf32>
    %cst_7 = arith.constant dense<0.000000e+00> : vector<2x128xf32>
    %8 = tpu.matmul %6, %7, %cst_7 {dimension_numbers = #tpu.dot_dimension_numbers<[1], [0], [0], [1], [0, 0, 1, 1], [], []>} : vector<2x32xf32>, vector<32x128xf32>, vector<2x128xf32> -> vector<2x128xf32>
    %c0_8 = arith.constant 0 : index
    %c0_9 = arith.constant 0 : index
    %9 = vector.load %arg5[%c0_8, %c0_9] : memref<1x128xf32, #tpu.memory_space<vmem>>, vector<1x128xf32>
    %10 = vector.broadcast %9 : vector<1x128xf32> to vector<2x128xf32>
    %11 = arith.addf %8, %10 : vector<2x128xf32>
    %c0_10 = arith.constant 0 : index
    %c0_11 = arith.constant 0 : index
    %12 = vector.load %arg6[%c0_10, %c0_11] : memref<2x128xf32, #tpu.memory_space<vmem>>, vector<2x128xf32>
    tpu.vector_store %arg6[%c0_10, %c0_11], %11 {strides = array<i32>} : memref<2x128xf32, #tpu.memory_space<vmem>>, vector<2x128xf32>,
    return
  }
  func.func @transform_0(%arg0: i32) -> (i32, i32) {
    %c0_i32 = arith.constant 0 : i32
    %c0_i32_0 = arith.constant 0 : i32
    return %arg0, %c0_i32 : i32, i32
  }
  func.func @transform_1(%arg0: i32) -> (i32, i32) {
    %c0_i32 = arith.constant 0 : i32
    %c0_i32_0 = arith.constant 0 : i32
    %c0_i32_1 = arith.constant 0 : i32
    return %c0_i32, %c0_i32_0 : i32, i32
  }
  func.func @transform_2(%arg0: i32) -> (i32, i32) {
    %c0_i32 = arith.constant 0 : i32
    %c0_i32_0 = arith.constant 0 : i32
    %c0_i32_1 = arith.constant 0 : i32
    return %c0_i32, %c0_i32_0 : i32, i32
  }
  func.func @transform_3(%arg0: i32) -> (i32, i32) {
    %c0_i32 = arith.constant 0 : i32
    %c0_i32_0 = arith.constant 0 : i32
    %c0_i32_1 = arith.constant 0 : i32
    return %c0_i32, %c0_i32_0 : i32, i32
  }
  func.func @transform_4(%arg0: i32) -> (i32, i32) {
    %c0_i32 = arith.constant 0 : i32
    %c0_i32_0 = arith.constant 0 : i32
    %c0_i32_1 = arith.constant 0 : i32
    return %c0_i32, %c0_i32_0 : i32, i32
  }
  func.func @transform_5(%arg0: i32) -> (i32, i32) {
    %c0_i32 = arith.constant 0 : i32
    %c0_i32_0 = arith.constant 0 : i32
    return %arg0, %c0_i32 : i32, i32
  }
}

</mosaic_0001>

<bundles_post_ra>
// kernel: tpu_custom_call.1
= control target key start
LH: loop header
LB: loop body
LE: loop exit
PB: predicated region body
PF: predicated region fallthrough
CT: control target
= control target key end

     0   :  { %10 = vsyncpa [#allocation3], 0  ;;  %s320_s0 = inlined_call_operand.hbm [shape: f32[2,32], index: 0, kind: input, shape index: {}]   ;;  %s321_s1 = inlined_call_operand.hbm [shape: f32[32,32], index: 1, kind: input, shape index: {}]   ;;  %s322_s2 = inlined_call_operand.vmem [shape: f32[1,32], index: 2, kind: input, shape index: {}]   ;;  %s323_s3 = inlined_call_operand.hbm [shape: f32[32,128], index: 3, kind: input, shape index: {}]   ;;  %s324_s4 = inlined_call_operand.vmem [shape: f32[1,128], index: 4, kind: input, shape index: {}]   ;;  %s325_s5 = inlined_call_operand.hbm [shape: f32[2,128], index: 5, kind: output, shape index: {}]  }
   0x1   :  { %11 = vsyncpa [#allocation6], 0  ;;  %s28_s20 = sshll.u32 %s321_s1, 4  ;;  %s29_s20 = int_to_ptr.hbm [resolvable:$true] %s28_s20 }
   0x2   :  { %12 = vsyncpa [#allocation4], 0  ;;  %s264_s21 = smov [#allocation5]   ;;  %s18_s25 = sshll.u32 %s320_s0, 4  ;;  %s19_s25 = int_to_ptr.hbm [resolvable:$true] %s18_s25 }
   0x3   :  { %s30_s22 = sshll.u32 %s264_s21, 4  ;;  %s265_s26 = smov 128   ;;  %s31_s22 = int_to_ptr.vmem [resolvable:$true] %s30_s22 }
   0x4   :  { %s266_s27 = smov 8   ;;  %s267_s28 = smov [#allocation2]  }
   0x5   :  { %36 = dma.hbm_to_vmem [thread:$0]  %s29_s20, 512, %s31_s22, [#allocation6], %s265_s26, %s265_s26, %s266_s27  }
   0x6   :  { %s20_s29 = sshll.u32 %s267_s28, 4  ;;  %s43_s7 = sshll.u32 %s323_s3, 4  ;;  %s21_s29 = int_to_ptr.vmem [resolvable:$true] %s20_s29  ;;  %s44_s7 = int_to_ptr.hbm [resolvable:$true] %s43_s7 }
   0x7   :  { %23 = dma.hbm_to_vmem [thread:$0]  %s19_s25, 32, %s21_s29, [#allocation3]  }
   0x8   :  { %s268_s1 = smov [#allocation7]  }
   0x9   :  { %s45_s8 = sshll.u32 %s268_s1, 4  ;;  %s46_s8 = int_to_ptr.vmem [resolvable:$true] %s45_s8 }
   0xa   :  { %51 = dma.hbm_to_vmem [thread:$0]  %s44_s7, 512, %s46_s8, [#allocation6], %s265_s26, %s265_s26, %s266_s27  }
   0xb   :  { %258 = dma.done.wait [#allocation3], 32  }
   0xc   :  { %259 = vsyncadd [#allocation3], 4294967264 }
   0xd   :  { %260 = dma.done.wait [#allocation6], 1024  }
   0xe   :  { %261 = vsyncadd [#allocation6], 4294966272  ;;  %v70_v0 = vld [vmem:[#allocation5 + $0x18] sm:$0xff]  ;;  %v69_v1 = vld [vmem:[#allocation5 + $0x10] sm:$0xff]  ;;  %vm75_vm0 = vcmask 261120   ;;  %s269_s11 = smov [#allocation8]  }
   0xf   :  { %91 = vmatpush.msra.mxu0 %v70_v0  ;;  %v68_v2 = vld [vmem:[#allocation5 + $0x8] sm:$0xff]  ;;  %v67_v3 = vld [vmem:[#allocation5] sm:$0xff]  ;;  %v66_v4 = vld [vmem:[#allocation2] sm:$0x3]  ;;  %s137_s12 = sshll.u32 %s269_s11, 4  ;;  %s139_s15 = sshll.u32 %s325_s5, 4  ;;  %s138_s12 = int_to_ptr.vmem [resolvable:$true] %s137_s12  ;;  %s140_s15 = int_to_ptr.hbm [resolvable:$true] %s139_s15 }
  0x10   :  { %v103_v5 = vld [vmem:[#allocation7 + $0x18] sm:$0xff]  ;;  %v102_v6 = vld [vmem:[#allocation7 + $0x10] sm:$0xff]  ;;  %v101_v7 = vld [vmem:[#allocation7 + $0x8] sm:$0xff] }
  0x11   :  { %92 = vmatpush.msra.mxu0 %v69_v1  ;;  %123 = vmatpush.msra.mxu1 %v103_v5  ;;  %v100_v8 = vld [vmem:[#allocation7] sm:$0xff]  ;;  %v158_v9 = vld [vmem:[%s322_s2] ss:$0 sm:$0xff] }
  0x12   :  { %v159_v13 = vld [vmem:[%s324_s4] ss:$0 sm:$0xff] }
  0x13   :  { %93 = vmatpush.msra.mxu0 %v68_v2  ;;  %124 = vmatpush.msra.mxu1 %v102_v6 }
  0x15   :  { %94 = vmatpush.msra.mxu0 %v67_v3  ;;  %125 = vmatpush.msra.mxu1 %v101_v7 }
  0x16   :  { %150 = vmatmul.msk.f32.vlgmr.msra.gmra.mxu0 %vm75_vm0, %v66_v4 }
  0x17   :  { %126 = vmatpush.msra.mxu1 %v100_v8 }
  0x93   :  { %v96_v10 = vpop.f32.mrf.mxu0 }
  0x94   :  { %v97_v11 = vadd.f32 %v158_v9, %v96_v10 }
  0x96   :  { %160 = vtanh.f32 %v97_v11 }
  0x9c   :  { %v161_v12 = vpop.eup %160 }
  0x9d   :  { %151 = vmatmul.msk.f32.vlgmr.msra.gmra.mxu1 %vm75_vm0, %v161_v12 }
 0x11a   :  { %v128_v14 = vpop.f32.mrf.mxu1 }
 0x11b   :  { %v129_v15 = vadd.f32 %v159_v13, %v128_v14 }
 0x11d   :  { %131 = vst [vmem:[#allocation8] sm:$0x3] %v129_v15 }
 0x11e   :  { %142 = dma.vmem_to_hbm [thread:$0]  %s138_s12, 32, %s140_s15, [#allocation4]  }
 0x11f   :  { %262 = dma.done.wait [#allocation4], 32  }
 0x120   :  { %263 = vsyncadd [#allocation4], 4294967264 }
 0x121   :  { %147 = vsyncpa [#allocation3], 1 }
 0x122   :  { %148 = vsyncpa [#allocation6], 1 }
 0x123   :  { %149 = vsyncpa [#allocation4], 1 }

</bundles_post_ra>
